<compile_context>
chip_gen: v6e
topology: v6e:2x2x1
jax: 0.10.0
libtpu: 0.0.40
codegen_flags: <defaults>
</compile_context>

<pallas_src>
import math
import functools

import jax
import jax.numpy as jnp
from jax.experimental import pallas as pl
from jax.experimental.pallas import tpu as pltpu


# ----------------------------------------------------------------------------
# small helpers
# ----------------------------------------------------------------------------
def _pick_tile(dim, prefs, align=8):
    """Tile choice: full dim when it already fits the largest preference, else the largest
    preferred divisor, else the largest `align`-multiple divisor (avoids huge single blocks)."""
    if dim <= prefs[0]:
        return dim
    for t in prefs:
        if dim % t == 0:
            return t
    for t in range(prefs[0], align - 1, -align):
        if dim % t == 0:
            return t
    return dim


def _pick_batch_tile(bs, cap=8):
    """Elements per attention grid step: as many as possible while keeping >=2 grid steps
    (so both v7x TensorCores get work)."""
    best = 1
    for bt in range(1, min(cap, bs) + 1):
        if bs % bt == 0 and bs // bt >= 2:
            best = bt
    return best


def _params(sems):
    # 48 MiB: safe on v7x (64 MiB/TC) while leaving double-buffer headroom; v5e/v6e could
    # raise this (128 MiB physical), not needed at these block sizes.
    return pltpu.CompilerParams(dimension_semantics=tuple(sems),
                                vmem_limit_bytes=48 * 1024 * 1024)


def _gelu(x):
    # tanh-approximation GELU; EUP-friendly so it fuses for free under the MXU/VPU.
    c = math.sqrt(2.0 / math.pi)
    return 0.5 * x * (1.0 + jnp.tanh(c * (x + 0.044715 * x * x * x)))


# ----------------------------------------------------------------------------
# Pallas kernels
# ----------------------------------------------------------------------------
def _mm_kernel(*refs, has_res, act):
    """(tm, tk) @ (tk, tn) accumulated over the K grid axis; bias/residual/GELU epilogue.
    Operands are cast to bf16 HERE (VPU cast hides under the MXU)."""
    if has_res:
        x_ref, w_ref, b_ref, r_ref, o_ref, acc_ref = refs
    else:
        x_ref, w_ref, b_ref, o_ref, acc_ref = refs
        r_ref = None
    k = pl.program_id(2)

    @pl.when(k == 0)
    def _init():
        acc_ref[...] = jnp.zeros_like(acc_ref)

    acc_ref[...] += jnp.dot(x_ref[...].astype(jnp.bfloat16),
                            w_ref[...].astype(jnp.bfloat16),
                            preferred_element_type=jnp.float32)

    @pl.when(k == pl.num_programs(2) - 1)
    def _finalize():
        out = acc_ref[...] + b_ref[...]
        if has_res:
            out = out + r_ref[...]
        if act:
            out = _gelu(out)
        o_ref[...] = out.astype(o_ref.dtype)


@functools.partial(jax.jit, static_argnames=('act', 'out_dtype'))
def matmul_pallas(x, w, b, residual=None, *, act=False, out_dtype=jnp.float32):
    """x:(M,K) @ w:(K,N) + b [,+ residual][, GELU]; in-kernel bf16 MXU, f32 accumulation."""
    M0, K = x.shape
    N = w.shape[1]
    M = ((M0 + 7) // 8) * 8                     # sublane-aligned rows (pad + slice)
    if M != M0:
        x = jnp.pad(x, ((0, M - M0), (0, 0)))
        if residual is not None:
            residual = jnp.pad(residual, ((0, M - M0), (0, 0)))
    tm = _pick_tile(M, (256, 128), align=8)
    tn = _pick_tile(N, (512, 256, 128), align=128)
    tk = _pick_tile(K, (512, 256, 128), align=128)
    grid = (M // tm, N // tn, K // tk)

    bf = b.reshape(1, N).astype(jnp.float32)
    in_specs = [
        pl.BlockSpec((tm, tk), lambda i, j, k: (i, k)),
        pl.BlockSpec((tk, tn), lambda i, j, k: (k, j)),
        pl.BlockSpec((1, tn), lambda i, j, k: (0, j)),
    ]
    args = [x, w.astype(jnp.float32), bf]
    if residual is not None:
        in_specs.append(pl.BlockSpec((tm, tn), lambda i, j, k: (i, j)))
        args.append(residual.astype(jnp.float32))

    out = pl.pallas_call(
        functools.partial(_mm_kernel, has_res=residual is not None, act=act),
        out_shape=jax.ShapeDtypeStruct((M, N), out_dtype),
        grid=grid,
        in_specs=in_specs,
        out_specs=pl.BlockSpec((tm, tn), lambda i, j, k: (i, j)),
        scratch_shapes=[pltpu.VMEM((tm, tn), jnp.float32)],
        compiler_params=_params(("parallel", "parallel", "arbitrary")),
    )(*args)
    if M != M0:
        out = out[:M0]
    return out


def _conv3x3_kernel(*refs, act, has_res):
    """Direct 3x3 stride-1 conv on the zero-padded image: 9 shifted in-kernel reads per
    input channel, VPU MAC with SMEM scalar weights; bias/residual/GELU fused."""
    if has_res:
        x_ref, w_ref, b_ref, r_ref, o_ref = refs
    else:
        x_ref, w_ref, b_ref, o_ref = refs
        r_ref = None
    _, cin, hp, wp = x_ref.shape
    _, cout, h, w = o_ref.shape
    offs = [(di, dj) for di in range(3) for dj in range(3)]
    for co in range(cout):
        acc = jnp.zeros((h, w), jnp.float32) + b_ref[co]
        for ci in range(cin):
            for t, (di, dj) in enumerate(offs):
                acc = acc + x_ref[0, ci, di:di + h, dj:dj + w] * w_ref[co, ci * 9 + t]
        if has_res:
            acc = acc + r_ref[0, co]
        if act:
            acc = _gelu(acc)
        o_ref[0, co] = acc


@functools.partial(jax.jit, static_argnames=('act',))
def conv3x3_pallas(xp, wmat, b, residual=None, *, act=False):
    """xp:(B,Cin,H+2,W+2) zero-padded, wmat:(Cout,Cin*9), b:(Cout,) -> (B,Cout,H,W) f32."""
    B, Cin, Hp, Wp = xp.shape
    H, W = Hp - 2, Wp - 2
    Cout = wmat.shape[0]
    in_specs = [
        pl.BlockSpec((1, Cin, Hp, Wp), lambda i: (i, 0, 0, 0)),
        pl.BlockSpec(memory_space=pltpu.MemorySpace.SMEM),
        pl.BlockSpec(memory_space=pltpu.MemorySpace.SMEM),
    ]
    args = [xp.astype(jnp.float32), wmat.astype(jnp.float32), b.astype(jnp.float32)]
    if residual is not None:
        in_specs.append(pl.BlockSpec((1, Cout, H, W), lambda i: (i, 0, 0, 0)))
        args.append(residual.astype(jnp.float32))
    return pl.pallas_call(
        functools.partial(_conv3x3_kernel, act=act, has_res=residual is not None),
        out_shape=jax.ShapeDtypeStruct((B, Cout, H, W), jnp.float32),
        grid=(B,),
        in_specs=in_specs,
        out_specs=pl.BlockSpec((1, Cout, H, W), lambda i: (i, 0, 0, 0)),
        compiler_params=_params(("parallel",)),
    )(*args)


def _dwconv3x3_kernel(x_ref, w_ref, b_ref, o_ref, *, act):
    """Depthwise 3x3 on reflect-padded input: in-kernel shifted reads, BN already folded."""
    _, c, hp, wp = x_ref.shape
    _, _, h, w = o_ref.shape
    offs = [(di, dj) for di in range(3) for dj in range(3)]
    for ch in range(c):
        acc = jnp.zeros((h, w), jnp.float32) + b_ref[ch]
        for t, (di, dj) in enumerate(offs):
            acc = acc + x_ref[0, ch, di:di + h, dj:dj + w] * w_ref[ch, t]
        if act:
            acc = _gelu(acc)
        o_ref[0, ch] = acc


@functools.partial(jax.jit, static_argnames=('act',))
def dwconv3x3_pallas(xp, w9, b, *, act=False):
    """xp:(B,C,H+2,W+2) reflect-padded, w9:(C,9), b:(C,) -> (B,C,H,W) f32."""
    B, C, Hp, Wp = xp.shape
    H, W = Hp - 2, Wp - 2
    return pl.pallas_call(
        functools.partial(_dwconv3x3_kernel, act=act),
        out_shape=jax.ShapeDtypeStruct((B, C, H, W), jnp.float32),
        grid=(B,),
        in_specs=[pl.BlockSpec((1, C, Hp, Wp), lambda i: (i, 0, 0, 0)),
                  pl.BlockSpec(memory_space=pltpu.MemorySpace.SMEM),
                  pl.BlockSpec(memory_space=pltpu.MemorySpace.SMEM)],
        out_specs=pl.BlockSpec((1, C, H, W), lambda i: (i, 0, 0, 0)),
        compiler_params=_params(("parallel",)),
    )(xp.astype(jnp.float32), w9.astype(jnp.float32), b.astype(jnp.float32))


def _chanmac_kernel(*refs, act, has_res):
    """Per-batch channel MAC on a lane-dense spatial tile: out = W @ X + b (VPU, channels
    are tiny so the MXU would be idle); bias/residual/GELU fused."""
    if has_res:
        x_ref, w_ref, b_ref, r_ref, o_ref = refs
    else:
        x_ref, w_ref, b_ref, o_ref = refs
        r_ref = None
    x = x_ref[0]                      # (K, tl)
    w = w_ref[...]                    # (Cout, K)
    K = x_ref.shape[1]
    acc = b_ref[...] + jnp.zeros((w.shape[0], x.shape[1]), jnp.float32)
    for k in range(K):
        acc = acc + w[:, k:k + 1] * x[k:k + 1, :]
    if has_res:
        acc = acc + r_ref[0]
    if act:
        acc = _gelu(acc)
    o_ref[0] = acc


@functools.partial(jax.jit, static_argnames=('act',))
def chan_mac_pallas(x, w, b, residual=None, *, act=False):
    """x:(B,K,L) lane-dense, w:(Cout,K), b:(Cout,) -> (B,Cout,L) f32.  Weight block shared
    across the (batch, spatial-tile) grid so it stays resident in VMEM."""
    B, K, L = x.shape
    Cout = w.shape[0]
    tl = _pick_tile(L, (1024, 512, 256, 128), align=128)
    grid = (B, L // tl)
    in_specs = [
        pl.BlockSpec((1, K, tl), lambda bb, l: (bb, 0, l)),
        pl.BlockSpec((Cout, K), lambda bb, l: (0, 0)),
        pl.BlockSpec((Cout, 1), lambda bb, l: (0, 0)),
    ]
    args = [x.astype(jnp.float32), w.astype(jnp.float32),
            b.reshape(Cout, 1).astype(jnp.float32)]
    if residual is not None:
        in_specs.append(pl.BlockSpec((1, Cout, tl), lambda bb, l: (bb, 0, l)))
        args.append(residual.astype(jnp.float32))
    return pl.pallas_call(
        functools.partial(_chanmac_kernel, act=act, has_res=residual is not None),
        out_shape=jax.ShapeDtypeStruct((B, Cout, L), jnp.float32),
        grid=grid,
        in_specs=in_specs,
        out_specs=pl.BlockSpec((1, Cout, tl), lambda bb, l: (bb, 0, l)),
        compiler_params=_params(("parallel", "parallel")),
    )(*args)


def _attn_kernel(qkv_ref, o_ref, *, scale, num_heads):
    """Reads the fused QKV GEMM output in its natural (bt,S,3,D) layout (no XLA transposes),
    per-head QK^T / softmax / PV; several batch/window elements per grid step."""
    bt, S, _, D = qkv_ref.shape
    hd = D // num_heads
    for b in range(bt):
        for h in range(num_heads):
            lo = h * hd
            q = qkv_ref[b, :, 0, lo:lo + hd]                # (S, hd) bf16
            k = qkv_ref[b, :, 1, lo:lo + hd]
            v = qkv_ref[b, :, 2, lo:lo + hd]
            s = jax.lax.dot_general(q, k, (((1,), (1,)), ((), ())),
                                    preferred_element_type=jnp.float32) * scale
            m = jnp.max(s, axis=-1, keepdims=True)
            p = jnp.exp(s - m)
            p = p * pl.reciprocal(jnp.sum(p, axis=-1, keepdims=True), approx=True)
            o = jax.lax.dot_general(p.astype(v.dtype), v, (((1,), (0,)), ((), ())),
                                    preferred_element_type=jnp.float32)
            o_ref[b, :, lo:lo + hd] = o.astype(o_ref.dtype)


@functools.partial(jax.jit, static_argnames=('num_heads',))
def attention_pallas(qkv, *, num_heads):
    """qkv:(BS, S, 3, D) (free view of the fused QKV GEMM output) -> (BS, S, D) bf16."""
    BS, S, _, D = qkv.shape
    hd = D // num_heads
    scale = 1.0 / math.sqrt(hd)
    bt = _pick_batch_tile(BS)
    return pl.pallas_call(
        functools.partial(_attn_kernel, scale=scale, num_heads=num_heads),
        out_shape=jax.ShapeDtypeStruct((BS, S, D), jnp.bfloat16),
        grid=(BS // bt,),
        in_specs=[pl.BlockSpec((bt, S, 3, D), lambda i: (i, 0, 0, 0))],
        out_specs=pl.BlockSpec((bt, S, D), lambda i: (i, 0, 0)),
        compiler_params=_params(("parallel",)),
    )(qkv.astype(jnp.bfloat16))


def _ln_kernel(x_ref, g_ref, b_ref, e_ref, et_ref, o_ref, *, inv_d, eps):
    """Lane-packed LayerNorm: r rows per 128-lane vreg; per-row mean/var via tiny segment
    matmuls (x @ E -> per-segment sums, @ E^T -> broadcast back), so stores stay lane-dense."""
    x = x_ref[...]
    e = e_ref[...]
    et = et_ref[...]
    mu = jnp.dot(x, e, preferred_element_type=jnp.float32) * inv_d
    mu_f = jnp.dot(mu, et, preferred_element_type=jnp.float32)
    xc = x - mu_f
    var = jnp.dot(xc * xc, e, preferred_element_type=jnp.float32) * inv_d
    var_f = jnp.dot(var, et, preferred_element_type=jnp.float32)
    o_ref[...] = xc * jax.lax.rsqrt(var_f + eps) * g_ref[...] + b_ref[...]


@jax.jit
def layernorm_pallas(x2d, gamma, beta):
    M0, D = x2d.shape
    r = 128 // D if (D < 128 and 128 % D == 0) else 1
    DL = r * D
    pad_mult = 8 * r // math.gcd(8, r)
    pad = (-M0) % pad_mult
    x = jnp.pad(x2d, ((0, pad), (0, 0))) if pad else x2d
    M = M0 + pad
    Mr = M // r
    xp = x.astype(jnp.float32).reshape(Mr, DL)
    tm = _pick_tile(Mr, (512, 256, 128), align=8)
    e = jnp.repeat(jnp.eye(r, dtype=jnp.float32), D, axis=0)        # (DL, r)
    g = jnp.tile(gamma.astype(jnp.float32), r).reshape(1, DL)
    bt = jnp.tile(beta.astype(jnp.float32), r).reshape(1, DL)
    out = pl.pallas_call(
        functools.partial(_ln_kernel, inv_d=1.0 / D, eps=1e-5),
        out_shape=jax.ShapeDtypeStruct((Mr, DL), jnp.float32),
        grid=(Mr // tm,),
        in_specs=[pl.BlockSpec((tm, DL), lambda i: (i, 0)),
                  pl.BlockSpec((1, DL), lambda i: (0, 0)),
                  pl.BlockSpec((1, DL), lambda i: (0, 0)),
                  pl.BlockSpec((DL, r), lambda i: (0, 0)),
                  pl.BlockSpec((r, DL), lambda i: (0, 0))],
        out_specs=pl.BlockSpec((tm, DL), lambda i: (i, 0)),
        compiler_params=_params(("parallel",)),
    )(xp, g, bt, e, e.T)
    out = out.reshape(M, D)
    return out[:M0] if pad else out


# ----------------------------------------------------------------------------
# JAX glue ops built on the Pallas kernels
# ----------------------------------------------------------------------------
def fold_bn_conv(w, b, bn, eps=1e-5):
    """Fold eval-mode BatchNorm2d into the preceding conv's weights/bias (exact)."""
    scale = bn['gamma'] / jnp.sqrt(bn['var'] + eps)
    shift = bn['beta'] - bn['mean'] * scale
    return w * scale[:, None, None, None], b * scale + shift


def batchnorm2d(x, p, eps=1e-5):
    """Standalone eval-mode BN (no adjacent conv to fold into) -> per-channel affine glue."""
    scale = p['gamma'] / jnp.sqrt(p['var'] + eps)
    shift = p['beta'] - p['mean'] * scale
    return x * scale[None, :, None, None] + shift[None, :, None, None]


def linear(x, p, residual=None, act=False, out_dtype=jnp.float32):
    shp = x.shape
    x2 = x.reshape(-1, shp[-1])
    res2 = None if residual is None else residual.reshape(-1, p['w'].shape[1])
    out = matmul_pallas(x2, p['w'], p['b'], res2, act=act, out_dtype=out_dtype)
    return out.reshape(shp[:-1] + (p['w'].shape[1],))


def conv3x3(x, w, b=None, residual=None, act=False):
    """3x3 stride-1 'same' conv in NCHW via the direct windowed Pallas kernel."""
    Cout, Cin = w.shape[0], w.shape[1]
    xp = jnp.pad(x, ((0, 0), (0, 0), (1, 1), (1, 1)))
    bb = jnp.zeros((Cout,), jnp.float32) if b is None else b
    return conv3x3_pallas(xp, w.reshape(Cout, Cin * 9), bb, residual, act=act)


def conv1x1_wb(x, w, b, residual=None, act=False):
    B, Cin, H, W = x.shape
    Cout = w.shape[0]
    res = None if residual is None else residual.reshape(B, Cout, H * W)
    out = chan_mac_pallas(x.reshape(B, Cin, H * W), w.reshape(Cout, Cin), b, res, act=act)
    return out.reshape(B, Cout, H, W)


def conv1x1(x, p, residual=None, act=False):
    return conv1x1_wb(x, p['w'], p['b'], residual, act)


def downsample_conv(x, w, b, scale, act=True):
    """DownSample conv (kernel=stride=scale) as size-preserving space-to-depth + channel MAC."""
    B, Cin, H, W = x.shape
    Cout = w.shape[0]
    Ho, Wo = H // scale, W // scale
    xs = x.reshape(B, Cin, Ho, scale, Wo, scale).transpose(0, 1, 3, 5, 2, 4)
    xs = xs.reshape(B, Cin * scale * scale, Ho * Wo)
    out = chan_mac_pallas(xs, w.reshape(Cout, Cin * scale * scale), b, act=act)
    return out.reshape(B, Cout, Ho, Wo)


def layer_norm(x, p):
    shp = x.shape
    out = layernorm_pallas(x.reshape(-1, shp[-1]), p['gamma'], p['beta'])
    return out.reshape(shp)


def dwconv(x, p, act=False):
    """DWConv: depthwise 3x3 (reflect pad 1), eval-mode BN folded, optional fused GELU."""
    C = x.shape[1]
    bn = p['bn']
    scale = bn['gamma'] / jnp.sqrt(bn['var'] + 1e-5)
    shift = bn['beta'] - bn['mean'] * scale
    w9 = p['w'].reshape(C, 9) * scale[:, None]
    b = p['b'] * scale + shift
    xp = jnp.pad(x, ((0, 0), (0, 0), (1, 1), (1, 1)), mode='reflect')
    return dwconv3x3_pallas(xp, w9, b, act=act)


# ----------------------------------------------------------------------------
# Sub-modules
# ----------------------------------------------------------------------------
def conv1x1_block(x, p):                       # Conv1x1 module (GELUs fused)
    out = conv1x1(x, p['c1'], act=True)
    out = conv1x1(out, p['c2'], act=True)
    return conv1x1(out, p['c3'])


def feb(x, p):                                 # FEB (GELUs fused into DWConv, residual fused)
    out = conv1x1(x, p['c_in'])
    out = dwconv(out, p['dw1'], act=True)
    out = dwconv(out, p['dw2'], act=True)
    return conv1x1(out, p['c_out'], residual=x)


def resconv(x, p):                             # ResConv (BN folded, GELU + residual fused)
    w1, b1 = fold_bn_conv(p['c1']['w'], p['c1']['b'], p['bn'])
    t = conv3x3(x, w1, b1, act=True)
    return conv3x3(t, p['c2']['w'], p['c2']['b'], residual=x)


def encoder_fwd(x, p):                         # Encoder
    x = resconv(x, p['res'])
    x = downsample_conv(x, p['down']['w'], p['down']['b'], p['scale'], act=True)
    return conv1x1(x, p['proj'])


def mhsa(x, p, num_heads=8, residual=None):
    """Self-attention (q=k=v as used here): fused QKV GEMM (bf16 out), attention reads the
    QKV output directly (no transposes), residual fused into the out-projection GEMM."""
    bs, S, d = x.shape
    wqkv = jnp.concatenate([p['Q']['w'], p['K']['w'], p['V']['w']], axis=1)   # (d, 3d)
    bqkv = jnp.concatenate([p['Q']['b'], p['K']['b'], p['V']['b']], axis=0)   # (3d,)
    qkv = matmul_pallas(x.reshape(bs * S, d), wqkv, bqkv, out_dtype=jnp.bfloat16)
    qkv = qkv.reshape(bs, S, 3, d)                                            # free view
    attn = attention_pallas(qkv, num_heads=num_heads)                         # (bs,S,d) bf16
    res2 = None if residual is None else residual.reshape(bs * S, d)
    out = matmul_pallas(attn.reshape(bs * S, d), p['O']['w'], p['O']['b'], res2)
    return out.reshape(bs, S, d)


def ffn(x, p, residual=None):                  # FeedForwardNet (GELU + residual fused)
    bs, S, d = x.shape
    h = matmul_pallas(x.reshape(bs * S, d), p['fc1']['w'], p['fc1']['b'],
                      act=True, out_dtype=jnp.bfloat16)
    res2 = None if residual is None else residual.reshape(bs * S, d)
    out = matmul_pallas(h, p['fc2']['w'], p['fc2']['b'], res2)
    return out.reshape(bs, S, d)


def make_pe_table(model_dim, max_len=64):      # Position_Encoding table
    pos = jnp.arange(max_len, dtype=jnp.float32).reshape(-1, 1)
    i_mat = jnp.power(10000.0,
                      jnp.arange(0, model_dim, 2, dtype=jnp.float32).reshape(1, -1) / model_dim)
    pe = jnp.zeros((max_len, model_dim), jnp.float32)
    pe = pe.at[:, 0::2].set(jnp.sin(pos / i_mat))
    pe = pe.at[:, 1::2].set(jnp.cos(pos / i_mat))
    return pe


def pos_enc(x, pe_table):
    return x + pe_table[:x.shape[1]][None, :, :]


def img2patch(img, ps):
    B, C, H, W = img.shape
    nH, nW = H // ps, W // ps
    x = img.reshape(B, C, nH, ps, nW, ps)
    x = x.transpose(0, 2, 4, 3, 5, 1)          # (B, nH, nW, p1, p2, C)
    return x.reshape(B, nH * nW, ps * ps * C)


def patch2img(patch, H, W, ps, C):             # equivalent of F.fold (non-overlapping)
    B = patch.shape[0]
    nH, nW = H // ps, W // ps
    x = patch.reshape(B, C, ps, ps, nH, nW)
    x = x.transpose(0, 1, 4, 2, 5, 3)          # (B, C, nH, p1, nW, p2)
    return x.reshape(B, C, H, W)


def patch2window(pe, ws):
    B, N, D = pe.shape
    h = int(math.sqrt(N))
    x = pe.reshape(B, h // ws, ws, h // ws, ws, D)
    x = x.transpose(0, 1, 3, 2, 4, 5)
    return x.reshape(B, (h // ws) * (h // ws), ws * ws, D)


def glencoder_fwd(x, p, enc_p, cfg, pe_table): # GLEncoder
    ps, ws, d = cfg['patch_size'], cfg['window_size'], cfg['model_dim']
    B, C, H, W = x.shape
    num_patches = (H // ps) * (W // ps)

    # global (window-level) branch
    win_img = encoder_fwd(x, enc_p)
    win_patch = img2patch(win_img, ps)
    window_embed = linear(win_patch, p['patch_embed'])
    cls = jnp.broadcast_to(p['cls_token'], (B, 1, d))
    window_embed = jnp.concatenate([cls, window_embed], axis=1)
    window_embed = pos_enc(window_embed, pe_table)
    we_ = layer_norm(window_embed, p['g_ln1'])
    window_embed = mhsa(we_, p['g_mhsa'], residual=window_embed)
    window_embed = ffn(layer_norm(window_embed, p['g_ln2']), p['g_ffn'],
                       residual=window_embed)
    cls_tokens = jnp.broadcast_to(window_embed[:, 0][:, None, :], (B, num_patches, d))

    # local (patch-level) branch
    patch = img2patch(x, ps)
    patch_embed = linear(patch, p['patch_embed'])
    patch_embed = jnp.concatenate([patch_embed, cls_tokens], axis=2)
    patch_embed = linear(linear(patch_embed, p['fc1'], act=True, out_dtype=jnp.bfloat16),
                         p['fc2'])

    # window multi-head self-attention
    window = patch2window(patch_embed, ws)
    bs, nw, npw, dd = window.shape
    window = window.reshape(bs * nw, npw, dd)
    window = pos_enc(window, pe_table)
    w_ = layer_norm(window, p['ln1'])
    wmhsa_out = mhsa(w_, p['mhsa'], residual=window)
    wmhsa_out = wmhsa_out.reshape(B, num_patches, d)
    wmhsa_out = ffn(layer_norm(wmhsa_out, p['ln2']), p['ffn'], residual=wmhsa_out)

    img = linear(wmhsa_out, p['proj'])          # (B, num_patches, ps*ps*C)
    img = jnp.swapaxes(img, -1, -2)             # (B, ps*ps*C, num_patches)
    return patch2img(img, H, W, ps, C)


def crossfuse_fwd(x, y, p):                    # CrossFuse
    B, C, H, W = x.shape
    x_h = jnp.mean(x, axis=3, keepdims=True)   # AdaptiveAvgPool2d((None,1))
    x_w = jnp.mean(x, axis=2, keepdims=True)   # AdaptiveAvgPool2d((1,None))
    y_h = jnp.mean(y, axis=3, keepdims=True)
    y_w = jnp.mean(y, axis=2, keepdims=True)
    cat = jnp.concatenate([x_h, y_h,
                           jnp.transpose(x_w, (0, 1, 3, 2)),
                           jnp.transpose(y_w, (0, 1, 3, 2))], axis=2)   # (B,C,2H+2W,1)
    pool_c = conv1x1_block(cat, p['poolc'])
    x_h2 = pool_c[:, :, 0:H]
    y_h2 = pool_c[:, :, H:2 * H]
    x_w2 = pool_c[:, :, 2 * H:2 * H + W]
    y_w2 = pool_c[:, :, 2 * H + W:2 * H + 2 * W]

    wc, bc = fold_bn_conv(p['conv_c']['c']['w'], p['conv_c']['c']['b'], p['conv_c']['bn'])
    xy = conv1x1_wb(jnp.concatenate([x, y], axis=1), wc, bc)
    xy = feb(xy, p['conv_c']['feb1'])
    xy = feb(xy, p['conv_c']['feb2'])

    def bn_feb_feb(t, q):
        t = batchnorm2d(t, q['bn'])
        t = feb(t, q['feb1'])
        return feb(t, q['feb2'])

    # matmul of (B,C,H,1) @ (B,C,1,W) == per-channel outer product
    x_hw_in = x_h2[:, :, :, 0][:, :, :, None] * x_w2[:, :, :, 0][:, :, None, :]
    y_hw_in = y_h2[:, :, :, 0][:, :, :, None] * y_w2[:, :, :, 0][:, :, None, :]
    x_hw = bn_feb_feb(x_hw_in, p['conv_1']) * xy
    y_hw = bn_feb_feb(y_hw_in, p['conv_2']) * xy
    return bn_feb_feb(x_hw + y_hw, p['conv_3']) + xy


def mainblock_fwd(spa, spe, p, cfg, pe_table): # MainBlock
    spa_all, spe_all = spa, spe
    mix_outs = []
    for i in range(cfg['num_blocks']):
        spa_ = glencoder_fwd(spa_all, p['spa_enc'][i], p['enc1'][i], cfg, pe_table)
        spa_all = spa_all + spa_
        spe_ = glencoder_fwd(spe_all, p['spe_enc'][i], p['enc2'][i], cfg, pe_table)
        spe_all = spe_all + spe_
        spe_all = crossfuse_fwd(spa_all, spe_all, p['mix'][i])
        mix_outs.append(spe_all)
    return jnp.concatenate(mix_outs, axis=1), spa_all


def base1_fwd(pan, lms, ms, p, cfg, pe_table): # Base1  (ms is unused, as in PyTorch)
    lap_w = jnp.array([[0., 1., 0.], [1., -4., 1.], [0., 1., 0.]],
                      jnp.float32).reshape(1, 1, 3, 3)
    pan_hp = conv3x3(pan, lap_w)                                       # get_edge
    spa = conv3x3(jnp.concatenate([pan, pan_hp, lms], axis=1),
                  p['spa_conv']['w'], p['spa_conv']['b'])
    spe = conv3x3(lms, p['spe_conv']['w'], p['spe_conv']['b'])

    out, spa_all = mainblock_fwd(spa, spe, p['main'], cfg, pe_table)

    t = conv3x3(out, p['res_conv']['c_in']['w'], p['res_conv']['c_in']['b'])
    for rp in p['res_conv']['res']:
        t = resconv(t, rp)
    out_final = conv3x3(t, p['res_conv']['c_out']['w'], p['res_conv']['c_out']['b'],
                        residual=lms)            # "+ lms" fused into the conv epilogue

    s = spa_all
    for rp in p['spa_rec']['res']:
        s = resconv(s, rp)
    s = conv3x3(s, p['spa_rec']['c_out']['w'], p['spa_rec']['c_out']['b'])
    return out_final, s


# ----------------------------------------------------------------------------
# Deterministic parameter initialization
# ----------------------------------------------------------------------------
class KeyGen:
    def __init__(self, seed=0):
        self._key = jax.random.PRNGKey(seed)

    def __call__(self):
        self._key, sub = jax.random.split(self._key)
        return sub


def init_conv(kg, cout, cin, k):
    fan_in = cin * k * k
    return {'w': jax.random.normal(kg(), (cout, cin, k, k), jnp.float32) / math.sqrt(fan_in),
            'b': jnp.zeros((cout,), jnp.float32)}


def init_linear(kg, din, dout):
    return {'w': jax.random.normal(kg(), (din, dout), jnp.float32) / math.sqrt(din),
            'b': jax.random.normal(kg(), (dout,), jnp.float32) * 0.01}


def init_bn(c):
    return {'gamma': jnp.ones((c,), jnp.float32), 'beta': jnp.zeros((c,), jnp.float32),
            'mean': jnp.zeros((c,), jnp.float32), 'var': jnp.ones((c,), jnp.float32)}


def init_ln(d):
    return {'gamma': jnp.ones((d,), jnp.float32), 'beta': jnp.zeros((d,), jnp.float32)}


def init_dwconv(kg, c):
    return {'w': jax.random.normal(kg(), (c, 3, 3), jnp.float32) / 3.0,
            'b': jnp.zeros((c,), jnp.float32), 'bn': init_bn(c)}


def init_feb(kg, c):
    return {'c_in': init_conv(kg, c, c, 1), 'dw1': init_dwconv(kg, c),
            'dw2': init_dwconv(kg, c), 'c_out': init_conv(kg, c, c, 1)}


def init_conv1x1_block(kg, cin, hid, cout):
    return {'c1': init_conv(kg, hid, cin, 1), 'c2': init_conv(kg, cout, hid, 1),
            'c3': init_conv(kg, cout, hid, 1)}


def init_crossfuse(kg, c):
    def bn_feb_feb():
        return {'bn': init_bn(c), 'feb1': init_feb(kg, c), 'feb2': init_feb(kg, c)}
    return {'poolc': init_conv1x1_block(kg, c, c, c),
            'conv_c': {'c': init_conv(kg, c, 2 * c, 1), 'bn': init_bn(c),
                       'feb1': init_feb(kg, c), 'feb2': init_feb(kg, c)},
            'conv_1': bn_feb_feb(), 'conv_2': bn_feb_feb(), 'conv_3': bn_feb_feb()}


def init_resconv(kg, cin, hid):
    return {'c1': init_conv(kg, hid, cin, 3), 'bn': init_bn(hid),
            'c2': init_conv(kg, cin, hid, 3)}


def init_encoder(kg, c, scale):
    return {'res': init_resconv(kg, c, c), 'down': init_conv(kg, c, c, scale),
            'proj': init_conv(kg, c, c, 1), 'scale': scale}


def init_mhsa(kg, d):
    return {'Q': init_linear(kg, d, d), 'K': init_linear(kg, d, d),
            'V': init_linear(kg, d, d), 'O': init_linear(kg, d, d)}


def init_ffn(kg, d):
    return {'fc1': init_linear(kg, d, 4 * d), 'fc2': init_linear(kg, 4 * d, d)}


def init_glencoder(kg, ps, d, c):
    patch_depth = ps * ps * c
    return {'patch_embed': init_linear(kg, patch_depth, d),
            'proj': init_linear(kg, d, patch_depth),
            'ln1': init_ln(d), 'ln2': init_ln(d),
            'mhsa': init_mhsa(kg, d), 'ffn': init_ffn(kg, d),
            'cls_token': jax.random.normal(kg(), (1, 1, d), jnp.float32) * 0.02,
            'g_ln1': init_ln(d), 'g_ln2': init_ln(d),
            'g_mhsa': init_mhsa(kg, d), 'g_ffn': init_ffn(kg, d),
            'fc1': init_linear(kg, 2 * d, d), 'fc2': init_linear(kg, d, d)}


def init_mainblock(kg, cfg):
    nb = cfg['num_blocks']
    ps, ws, d, c = cfg['patch_size'], cfg['window_size'], cfg['model_dim'], cfg['hidden_ch']
    scale = 2 ** int(math.log(ws, 2))
    return {'spa_enc': [init_glencoder(kg, ps, d, c) for _ in range(nb)],
            'spe_enc': [init_glencoder(kg, ps, d, c) for _ in range(nb)],
            'mix': [init_crossfuse(kg, c) for _ in range(nb)],
            'enc1': [init_encoder(kg, c, scale) for _ in range(nb)],
            'enc2': [init_encoder(kg, c, scale) for _ in range(nb)]}


def init_base1(kg, cfg):
    c, nb, lms_ch = cfg['hidden_ch'], cfg['num_blocks'], cfg['lms_ch']
    return {'spa_conv': init_conv(kg, c, 2 + lms_ch, 3),
            'spe_conv': init_conv(kg, c, lms_ch, 3),
            'main': init_mainblock(kg, cfg),
            'res_conv': {'c_in': init_conv(kg, c, c * nb, 3),
                         'res': [init_resconv(kg, c, c) for _ in range(6)],
                         'c_out': init_conv(kg, lms_ch, c, 3)},
            'spa_rec': {'res': [init_resconv(kg, c, c) for _ in range(4)],
                        'c_out': init_conv(kg, 1, c, 3)}}


# ----------------------------------------------------------------------------
if __name__ == "__main__":
    cfg = dict(patch_size=2, window_size=2, model_dim=32,
               hidden_ch=4, num_blocks=1, lms_ch=4)
    B, H, W = 2, 8, 8

    kg = KeyGen(0)
    params = init_base1(kg, cfg)
    pe_table = make_pe_table(cfg['model_dim'], max_len=64)

    key = jax.random.PRNGKey(0)
    k1, k2, k3 = jax.random.split(key, 3)
    pan = jax.random.normal(k1, (B, 1, H, W), jnp.float32)
    lms = jax.random.normal(k2, (B, cfg['lms_ch'], H, W), jnp.float32)
    ms = jax.random.normal(k3, (B, cfg['lms_ch'], H // 2, W // 2), jnp.float32)  # unused

    out, spa_rec = base1_fwd(pan, lms, ms, params, cfg, pe_table)
    jax.block_until_ready((out, spa_rec))

    assert out.shape == (B, cfg['lms_ch'], H, W)
    assert spa_rec.shape == (B, 1, H, W)
    assert bool(jnp.all(jnp.isfinite(out))) and bool(jnp.all(jnp.isfinite(spa_rec)))
    print("KERNEL_OK")
</pallas_src>

<mosaic_0001>
module attributes {stable_mosaic.version = 11 : i64} {
  func.func @_conv3x3_kernel(%arg0: i32, %arg1: memref<1x1x10x10xf32, #tpu.memory_space<vmem>>, %arg2: memref<1x9xf32, #tpu.memory_space<smem>>, %arg3: memref<1xf32, #tpu.memory_space<smem>>, %arg4: memref<1x1x8x8xf32, #tpu.memory_space<vmem>>) attributes {dimension_semantics = [#tpu.dimension_semantics<parallel>], iteration_bounds = array<i64: 2>, scalar_prefetch = 0 : i64, scratch_operands = 0 : i64, tpu.core_type = #tpu.core_type<tc>, window_params = [{transform_indices = @transform_0, window_bounds = array<i64: 1, 1, 10, 10>}, {transform_indices = @transform_1, window_bounds = array<i64: 1, 9>}, {transform_indices = @transform_2, window_bounds = array<i64: 1>}, {transform_indices = @transform_3, window_bounds = array<i64: 1, 1, 8, 8>}]} {
    %cst = arith.constant 0.000000e+00 : f32
    %0 = vector.broadcast %cst : f32 to vector<8x8xf32>
    %c0 = arith.constant 0 : index
    %1 = memref.load %arg3[%c0] : memref<1xf32, #tpu.memory_space<smem>>
    %2 = vector.broadcast %1 : f32 to vector<8x8xf32>
    %3 = arith.addf %0, %2 : vector<8x8xf32>
    %c0_0 = arith.constant 0 : index
    %c0_1 = arith.constant 0 : index
    %c0_2 = arith.constant 0 : index
    %c0_3 = arith.constant 0 : index
    %4 = vector.load %arg1[%c0_0, %c0_1, %c0_2, %c0_3] : memref<1x1x10x10xf32, #tpu.memory_space<vmem>>, vector<1x1x8x8xf32>
    %5 = vector.shape_cast %4 : vector<1x1x8x8xf32> to vector<8x8xf32>
    %c0_4 = arith.constant 0 : index
    %c0_5 = arith.constant 0 : index
    %6 = memref.load %arg2[%c0_4, %c0_5] : memref<1x9xf32, #tpu.memory_space<smem>>
    %7 = vector.broadcast %6 : f32 to vector<8x8xf32>
    %8 = arith.mulf %5, %7 : vector<8x8xf32>
    %9 = arith.addf %3, %8 : vector<8x8xf32>
    %c0_6 = arith.constant 0 : index
    %c0_7 = arith.constant 0 : index
    %c0_8 = arith.constant 0 : index
    %c1 = arith.constant 1 : index
    %10 = vector.load %arg1[%c0_6, %c0_7, %c0_8, %c1] : memref<1x1x10x10xf32, #tpu.memory_space<vmem>>, vector<1x1x8x8xf32>
    %11 = vector.shape_cast %10 : vector<1x1x8x8xf32> to vector<8x8xf32>
    %c0_9 = arith.constant 0 : index
    %c1_10 = arith.constant 1 : index
    %12 = memref.load %arg2[%c0_9, %c1_10] : memref<1x9xf32, #tpu.memory_space<smem>>
    %13 = vector.broadcast %12 : f32 to vector<8x8xf32>
    %14 = arith.mulf %11, %13 : vector<8x8xf32>
    %15 = arith.addf %9, %14 : vector<8x8xf32>
    %c0_11 = arith.constant 0 : index
    %c0_12 = arith.constant 0 : index
    %c0_13 = arith.constant 0 : index
    %c2 = arith.constant 2 : index
    %16 = vector.load %arg1[%c0_11, %c0_12, %c0_13, %c2] : memref<1x1x10x10xf32, #tpu.memory_space<vmem>>, vector<1x1x8x8xf32>
    %17 = vector.shape_cast %16 : vector<1x1x8x8xf32> to vector<8x8xf32>
    %c0_14 = arith.constant 0 : index
    %c2_15 = arith.constant 2 : index
    %18 = memref.load %arg2[%c0_14, %c2_15] : memref<1x9xf32, #tpu.memory_space<smem>>
    %19 = vector.broadcast %18 : f32 to vector<8x8xf32>
    %20 = arith.mulf %17, %19 : vector<8x8xf32>
    %21 = arith.addf %15, %20 : vector<8x8xf32>
    %c0_16 = arith.constant 0 : index
    %c0_17 = arith.constant 0 : index
    %c1_18 = arith.constant 1 : index
    %c0_19 = arith.constant 0 : index
    %22 = vector.load %arg1[%c0_16, %c0_17, %c1_18, %c0_19] : memref<1x1x10x10xf32, #tpu.memory_space<vmem>>, vector<1x1x8x8xf32>
    %23 = vector.shape_cast %22 : vector<1x1x8x8xf32> to vector<8x8xf32>
    %c0_20 = arith.constant 0 : index
    %c3 = arith.constant 3 : index
    %24 = memref.load %arg2[%c0_20, %c3] : memref<1x9xf32, #tpu.memory_space<smem>>
    %25 = vector.broadcast %24 : f32 to vector<8x8xf32>
    %26 = arith.mulf %23, %25 : vector<8x8xf32>
    %27 = arith.addf %21, %26 : vector<8x8xf32>
    %c0_21 = arith.constant 0 : index
    %c0_22 = arith.constant 0 : index
    %c1_23 = arith.constant 1 : index
    %c1_24 = arith.constant 1 : index
    %28 = vector.load %arg1[%c0_21, %c0_22, %c1_23, %c1_24] : memref<1x1x10x10xf32, #tpu.memory_space<vmem>>, vector<1x1x8x8xf32>
    %29 = vector.shape_cast %28 : vector<1x1x8x8xf32> to vector<8x8xf32>
    %c0_25 = arith.constant 0 : index
    %c4 = arith.constant 4 : index
    %30 = memref.load %arg2[%c0_25, %c4] : memref<1x9xf32, #tpu.memory_space<smem>>
    %31 = vector.broadcast %30 : f32 to vector<8x8xf32>
    %32 = arith.mulf %29, %31 : vector<8x8xf32>
    %33 = arith.addf %27, %32 : vector<8x8xf32>
    %c0_26 = arith.constant 0 : index
    %c0_27 = arith.constant 0 : index
    %c1_28 = arith.constant 1 : index
    %c2_29 = arith.constant 2 : index
    %34 = vector.load %arg1[%c0_26, %c0_27, %c1_28, %c2_29] : memref<1x1x10x10xf32, #tpu.memory_space<vmem>>, vector<1x1x8x8xf32>
    %35 = vector.shape_cast %34 : vector<1x1x8x8xf32> to vector<8x8xf32>
    %c0_30 = arith.constant 0 : index
    %c5 = arith.constant 5 : index
    %36 = memref.load %arg2[%c0_30, %c5] : memref<1x9xf32, #tpu.memory_space<smem>>
    %37 = vector.broadcast %36 : f32 to vector<8x8xf32>
    %38 = arith.mulf %35, %37 : vector<8x8xf32>
    %39 = arith.addf %33, %38 : vector<8x8xf32>
    %c0_31 = arith.constant 0 : index
    %c0_32 = arith.constant 0 : index
    %c2_33 = arith.constant 2 : index
    %c0_34 = arith.constant 0 : index
    %40 = vector.load %arg1[%c0_31, %c0_32, %c2_33, %c0_34] : memref<1x1x10x10xf32, #tpu.memory_space<vmem>>, vector<1x1x8x8xf32>
    %41 = vector.shape_cast %40 : vector<1x1x8x8xf32> to vector<8x8xf32>
    %c0_35 = arith.constant 0 : index
    %c6 = arith.constant 6 : index
    %42 = memref.load %arg2[%c0_35, %c6] : memref<1x9xf32, #tpu.memory_space<smem>>
    %43 = vector.broadcast %42 : f32 to vector<8x8xf32>
    %44 = arith.mulf %41, %43 : vector<8x8xf32>
    %45 = arith.addf %39, %44 : vector<8x8xf32>
    %c0_36 = arith.constant 0 : index
    %c0_37 = arith.constant 0 : index
    %c2_38 = arith.constant 2 : index
    %c1_39 = arith.constant 1 : index
    %46 = vector.load %arg1[%c0_36, %c0_37, %c2_38, %c1_39] : memref<1x1x10x10xf32, #tpu.memory_space<vmem>>, vector<1x1x8x8xf32>
    %47 = vector.shape_cast %46 : vector<1x1x8x8xf32> to vector<8x8xf32>
    %c0_40 = arith.constant 0 : index
    %c7 = arith.constant 7 : index
    %48 = memref.load %arg2[%c0_40, %c7] : memref<1x9xf32, #tpu.memory_space<smem>>
    %49 = vector.broadcast %48 : f32 to vector<8x8xf32>
    %50 = arith.mulf %47, %49 : vector<8x8xf32>
    %51 = arith.addf %45, %50 : vector<8x8xf32>
    %c0_41 = arith.constant 0 : index
    %c0_42 = arith.constant 0 : index
    %c2_43 = arith.constant 2 : index
    %c2_44 = arith.constant 2 : index
    %52 = vector.load %arg1[%c0_41, %c0_42, %c2_43, %c2_44] : memref<1x1x10x10xf32, #tpu.memory_space<vmem>>, vector<1x1x8x8xf32>
    %53 = vector.shape_cast %52 : vector<1x1x8x8xf32> to vector<8x8xf32>
    %c0_45 = arith.constant 0 : index
    %c8 = arith.constant 8 : index
    %54 = memref.load %arg2[%c0_45, %c8] : memref<1x9xf32, #tpu.memory_space<smem>>
    %55 = vector.broadcast %54 : f32 to vector<8x8xf32>
    %56 = arith.mulf %53, %55 : vector<8x8xf32>
    %57 = arith.addf %51, %56 : vector<8x8xf32>
    %c0_46 = arith.constant 0 : index
    %c0_47 = arith.constant 0 : index
    %c0_48 = arith.constant 0 : index
    %c0_49 = arith.constant 0 : index
    %58 = vector.load %arg4[%c0_46, %c0_47, %c0_48, %c0_49] : memref<1x1x8x8xf32, #tpu.memory_space<vmem>>, vector<1x1x8x8xf32>
    %59 = vector.shape_cast %58 : vector<1x1x8x8xf32> to vector<8x8xf32>
    %60 = vector.shape_cast %57 : vector<8x8xf32> to vector<1x1x8x8xf32>
    tpu.vector_store %arg4[%c0_46, %c0_47, %c0_48, %c0_49], %60 {strides = array<i32>} : memref<1x1x8x8xf32, #tpu.memory_space<vmem>>, vector<1x1x8x8xf32>,
    return
  }
  func.func @transform_0(%arg0: i32) -> (i32, i32, i32, i32) {
    %c0_i32 = arith.constant 0 : i32
    %c0_i32_0 = arith.constant 0 : i32
    %c0_i32_1 = arith.constant 0 : i32
    %c0_i32_2 = arith.constant 0 : i32
    return %arg0, %c0_i32, %c0_i32_0, %c0_i32_1 : i32, i32, i32, i32
  }
  func.func @transform_1(%arg0: i32) -> (i32, i32) {
    %c0_i32 = arith.constant 0 : i32
    %c0_i32_0 = arith.constant 0 : i32
    %c0_i32_1 = arith.constant 0 : i32
    return %c0_i32, %c0_i32_0 : i32, i32
  }
  func.func @transform_2(%arg0: i32) -> i32 {
    %c0_i32 = arith.constant 0 : i32
    %c0_i32_0 = arith.constant 0 : i32
    return %c0_i32 : i32
  }
  func.func @transform_3(%arg0: i32) -> (i32, i32, i32, i32) {
    %c0_i32 = arith.constant 0 : i32
    %c0_i32_0 = arith.constant 0 : i32
    %c0_i32_1 = arith.constant 0 : i32
    %c0_i32_2 = arith.constant 0 : i32
    return %arg0, %c0_i32, %c0_i32_0, %c0_i32_1 : i32, i32, i32, i32
  }
}

</mosaic_0001>

<bundles_post_ra>
// kernel: conv3x3_pallas.1
= control target key start
LH: loop header
LB: loop body
LE: loop exit
PB: predicated region body
PF: predicated region fallthrough
CT: control target
= control target key end

     0   :  { %s624_s0 = inlined_call_operand.vmem [shape: f32[2,1,10,10], index: 0, kind: input, shape index: {}]   ;;  %s625_s1 = inlined_call_operand.vmem [shape: f32[1,9], index: 1, kind: input, shape index: {}]   ;;  %s626_s2 = inlined_call_operand.<no memory space> [shape: f32[1], index: 2, kind: input, shape index: {}]   ;;  %s627_s3 = inlined_call_operand.hbm [shape: f32[2,1,8,8], index: 3, kind: output, shape index: {}]  }
   0x1   :  { %8 = sst [smem:[#allocation2]] %s626_s2 }
   0x2   :  { %9 = vsyncpa [#allocation5], 0 }
   0x3   :  { %10 = vsyncpa [#allocation4], 0 }
   0x4   :  { %12 = vsyncpa [#allocation4 + $0x1], 0  ;;  %s519_s14 = smov 0   ;;  %s521_s15 = smov 0  }
   0x5   :  { %s523_s16 = smov 0   ;;  %s525_s17 = smov 0  }
   0x6 LB: > { %s540_s2 = sadd.s32 4294967295, %s490_s17   ;;  %s337_s18 = sadd.s32 4294967294, %s490_s17   ;;  %s490_s17 = sphi %s525_s17, %s634_s17   ;;  %s486_s16 = sphi %s523_s16, %s633_s16   ;;  %s482_s15 = sphi %s521_s15, %s632_s15   ;;  %s478_s14 = sphi %s519_s14, %s631_s14  }
   0x7   : > { %s544_s19 = sadd.s32 1, %s490_s17   ;;  %s93_s20 = sadd.s32 1, %s486_s16 }
   0x8   : > { %s90_s21 = ssub.s32 %s490_s17, %s544_s19  ;;  %p103_p0 = scmp.ne.s32.totalorder %s486_s16, %s482_s15 }
   0x9   : > { %p91_p1 = scmp.eq.s32.totalorder %s90_s21, 0  ;;  %p104_p2 = scmp.eq.s32.totalorder %s540_s2, 1 }
   0xa   : > { %p109_p3 = scmp.ne.s32.totalorder %s482_s15, %s478_s14  ;;  %p110_p4 = scmp.eq.s32.totalorder %s337_s18, 1 }
   0xb   : > { %s555_s22 = scalar_select %p91_p1, %s486_s16, %s93_s20  }
   0xc   : > { %p557_p5 = por %p104_p2, %p103_p0  ;;  %p561_p6 = por %p110_p4, %p109_p3 }
   0xd   : > { %p338_p7 = scmp.ge.s32.totalorder %s490_s17, 1  ;;  %p117_p8 = scmp.lt.s32.totalorder %s490_s17, 3 }
   0xe   : > { %p373_p9 = scmp.eq.s32.totalorder %s540_s2, 0  ;;  %s130_s28 = sshll.u32 %s625_s1, 4  ;;  %s131_s28 = int_to_ptr.vmem [resolvable:$true] %s130_s28 }
   0xf   : > { %p568_p10 = pnand %p338_p7, %p117_p8  ;;  %s411_s29 = scalar_lea.vmem %s131_s28, 16 }
  0x10   : > { %p412_p13 = scmp.ne.s32.totalorder %s131_s28, %s411_s29  ;;  %p419_p3 = scmp.lt.s32.totalorder %s131_s28, %s131_s28 }
  0x11   : > { %p365_p11 = pneg %p568_p10  ;;  %p420_p4 = scmp.lt.s32.totalorder %s411_s29, %s411_s29 }
  0x13   : > { %p366_p12 = pnand %p373_p9, %p365_p11  ;;  %p421_p7 = por %p420_p4, %p419_p3 }
  0x15   : > { %p413_p0 = pneg %p366_p12 }
  0x17   : > { %p414_p1 = pnand %p413_p0, %p412_p13 }
  0x19   : > { %p415_p2 = pneg %p414_p1 }
  0x1b   : > { %p422_p8 = pnand %p421_p7, %p415_p2 }
  0x1d   : > { %425 = shalt.err (!%p422_p8)
}
  0x1e   : > { %s492_s30 = smov [#allocation3]   ;;  %154 = sbr.rel (%p568_p10) target bundleno = 193 (0xc1), region = 32 }
  0x1f   : > { %368 = dma.vmem_to_smem (!%p366_p12), %s131_s28, 16, %s492_s30, [#allocation5]  }
  0x23   : > { %469 = dma.done.wait (%p373_p9), [#allocation5], 16  }
  0x24   : > { %471 = vsyncadd (%p373_p9), [#allocation5], 4294967280 }
  0x25   : > { %160 = sfence }
  0x26   : > { %p179_p11 = scmp.lt.s32.totalorder %s540_s2, 1  ;;  %s346_s4 = sld [smem:[#allocation3 + $0x1]]  ;;  %vm250_vm0 = vcmask 64512  }
  0x27   : > { %s347_s5 = sld [smem:[#allocation3 + $0x2]]  ;;  %s493_s20 = smov 127  }
  0x28   : > { %s180_s6 = scalar_select %p179_p11, %s540_s2, 1 }
  0x29   : > { %s349_s7 = sld [smem:[#allocation3 + $0x4]]  ;;  %s494_s21 = smov 126  }
  0x2a   : > { %s358_s8 = sshll.u32 %s180_s6, 4  ;;  %s350_s9 = sld [smem:[#allocation3 + $0x5]] }
  0x2b   : > { %s183_s12 = scalar_lea.vmem %s624_s0, %s358_s8  ;;  %s352_s13 = sld [smem:[#allocation3 + $0x7]] }
  0x2c   : > { %v187_v0 = vld [vmem:[%s183_s12] sm:$0xff]  ;;  %v193_v1 = vstv %s346_s4  ;;  %s353_s18 = sld [smem:[#allocation3 + $0x8]]  ;;  %s176_s29 = sand.u32 1, %s482_s15  }
  0x2d   : > { %v194_v2 = vmul.f32 %v193_v1, %v187_v0  ;;  %v201_v3 = vstv %s347_s5  ;;  %v208_v4 = vld [vmem:[%s183_s12 + $0x1] sm:$0xff]  ;;  %s188_s25 = sld [smem:[#allocation3]]  ;;  %s343_s30 = sshll.u32 %s176_s29, 3 }
  0x2e   : > { %v202_v5 = vmul.f32 %v201_v3, %v187_v0  ;;  %v229_v9 = vld [vmem:[%s183_s12 + $0x2] sm:$0xff]  ;;  %s184_s26 = sld [smem:[#allocation2]]  ;;  %s355_s4 = sshll.u32 %s540_s2, 7 }
  0x2f   : > { %196 = vrot.lane.b32.xlu0 %v194_v2, %s493_s20  ;;  %v214_v6 = vstv %s349_s7  ;;  %s348_s27 = sld [smem:[#allocation3 + $0x3]]  ;;  %s178_s5 = scalar_lea.vmem [#allocation6], %s343_s30 }
  0x30   : > { %v215_v7 = vmul.f32 %v214_v6, %v208_v4  ;;  %v222_v8 = vstv %s350_s9  ;;  %s351_s28 = sld [smem:[#allocation3 + $0x6]]  ;;  %s266_s6 = sshll.u32 %s178_s5, 4  ;;  %s267_s6 = int_to_ptr.vmem [resolvable:$true] %s266_s6 }
  0x31   : > { %v235_v10 = vstv %s352_s13  ;;  %v223_v11 = vmul.f32 %v222_v8, %v208_v4  ;;  %s264_s9 = scalar_lea.hbm %s627_s3, %s355_s4  ;;  %s253_s10 = scalar_lea.sflag [#allocation4], %s176_s29 }
  0x32   : > { %217 = vrot.lane.b32.xlu1 %v215_v7, %s493_s20  ;;  %v236_v12 = vmul.f32 %v235_v10, %v229_v9  ;;  %v243_v13 = vstv %s353_s18  ;;  %s426_s11 = scalar_lea.vmem %s267_s6, 128  ;;  %s495_s12 = smov [#allocation6]  }
  0x33   : > { %204 = vrot.lane.b32.xlu0 %v202_v5, %s494_s21  ;;  %v244_v14 = vmul.f32 %v243_v13, %v229_v9  ;;  %v189_v15 = vstv %s188_s25  ;;  %p427_p9 = scmp.ne.s32.totalorder %s267_s6, %s426_s11  ;;  %s430_s13 = sshll.u32 %s495_s12, 4  ;;  %s431_s13 = int_to_ptr.vmem [resolvable:$false] %s430_s13 }
  0x34   : > { %v190_v16 = vmul.f32 %v189_v15, %v187_v0  ;;  %v185_v17 = vstv %s184_s26  ;;  %s432_s2 = scalar_lea.vmem %s431_s13, 256  ;;  %p433_p13 = scmp.lt.s32.totalorder %s267_s6, %s431_s13 }
  0x35   : > { %v210_v20 = vstv %s348_s27  ;;  %p428_p10 = pnand %p427_p9, %p557_p5  ;;  %p434_p0 = scmp.lt.s32.totalorder %s432_s2, %s426_s11 }
  0x36   : > { %225 = vrot.lane.b32.xlu1 %v223_v11, %s494_s21  ;;  %v191_v18 = vadd.f32 %v190_v16, %v185_v17  ;;  %v211_v23 = vmul.f32 %v210_v20, %v208_v4  ;;  %v231_v26 = vstv %s351_s28 }
  0x37   : > { %238 = vrot.lane.b32.xlu0 %v236_v12, %s493_s20  ;;  %v232_v30 = vmul.f32 %v231_v26, %v229_v9  ;;  %p429_p12 = pneg %p428_p10  ;;  %p435_p1 = por %p434_p0, %p433_p13 }
  0x39   : > { %p436_p2 = pnand %p435_p1, %p429_p12 }
  0x3a   : > { %246 = vrot.lane.b32.xlu1 %v244_v14, %s494_s21 }
  0xa1   : > { %v197_v19 = vpop.permute.xlu0 %196 }
  0xa2   : > { %v199_v21 = vadd.f32 %v197_v19, %v191_v18 }
  0xa4   : > { %v218_v22 = vpop.permute.xlu1 %217 }
  0xa5   : > { %v205_v24 = vpop.permute.xlu0 %204 }
  0xa6   : > { %v207_v25 = vadd.f32 %v205_v24, %v199_v21 }
  0xa8   : > { %v212_v27 = vadd.f32 %v211_v23, %v207_v25  ;;  %v226_v28 = vpop.permute.xlu1 %225 }
  0xa9   : > { %v239_v32 = vpop.permute.xlu0 %238 }
  0xaa   : > { %v220_v29 = vadd.f32 %v218_v22, %v212_v27 }
  0xac   : > { %v228_v31 = vadd.f32 %v226_v28, %v220_v29  ;;  %v247_v34 = vpop.permute.xlu1 %246 }
  0xae   : > { %v233_v33 = vadd.f32 %v232_v30, %v228_v31 }
  0xb0   : > { %v241_v35 = vadd.f32 %v239_v32, %v233_v33 }
  0xb2   : > { %v249_v36 = vadd.f32 %v247_v34, %v241_v35 }
  0xb4   : > { %251 = vst.msk [vmem:[%s178_s5] sm:$0xff] %vm250_vm0, %v249_v36 }
  0xb5   : > { %439 = shalt.err (!%p436_p2)
}
  0xb6   : > { %s440_s18 = scalar_lea.hbm %s264_s9, 128  ;;  %s444_s25 = scalar_lea.hbm %s627_s3, 256 }
  0xb7   : > { %p441_p3 = scmp.ne.s32.totalorder %s264_s9, %s440_s18  ;;  %p445_p8 = scmp.lt.s32.totalorder %s264_s9, %s627_s3 }
  0xb8   : > { %p446_p11 = scmp.lt.s32.totalorder %s444_s25, %s440_s18 }
  0xb9   : > { %p442_p4 = pnand %p441_p3, %p557_p5 }
  0xba   : > { %p447_p9 = por %p446_p11, %p445_p8 }
  0xbb   : > { %p443_p7 = pneg %p442_p4 }
  0xbd   : > { %p448_p10 = pnand %p447_p9, %p443_p7 }
  0xbf   : > { %451 = shalt.err (!%p448_p10)
}
  0xc0   : > { %363 = dma.vmem_to_hbm [thread:$0]  (%p557_p5), %s267_s6, 128, %s264_s9, %s253_s10  }
  0xc1 PF: > { %p375_p12 = scmp.ge.s32.totalorder %s490_s17, 2  ;;  %s278_s28 = sand.u32 1, %s478_s14  }
  0xc2   : > { %s279_s29 = scalar_lea.sflag [#allocation4], %s278_s28 }
  0xc3   : > { %p370_p13 = pnand %p375_p12, %p561_p6 }
  0xc5   : > { %p371_p0 = pneg %p370_p13 }
  0xc7   : > { %473 = dma.done.wait (%p371_p0), %s279_s29, 128  }
  0xc8   : > { %475 = vsyncadd (%p371_p0), %s279_s29, 4294967168  ;;  %p15_p1 = scmp.ge.s32.totalorder %s544_s19, 4   ;;  %s631_s14 = smov %s482_s15 }
  0xc9   : > { %s632_s15 = smov %s486_s16  ;;  %s633_s16 = smov %s555_s22 }
  0xca   : > { %s634_s17 = smov %s544_s19  ;;  %17 = sbr.rel (!%p15_p1) target bundleno = 6 (0x6), region = 72 }
  0xcf   :  { %284 = vsyncpa [#allocation4], 1 }
  0xd0   :  { %286 = vsyncpa [#allocation4 + $0x1], 1 }
  0xd1   :  { %287 = vsyncpa [#allocation5], 1 }
  0xd2   :  { %289 = vsyncpa [#allocation5 + $0x1], 1 }

</bundles_post_ra>
